<compile_context>
chip_gen: v7x
topology: tpu7x:2x2x1
jax: 0.10.0
libtpu: 0.0.40
codegen_flags: <defaults>
</compile_context>

<pallas_src>
import jax
import jax.numpy as jnp
from jax import lax
from jax.experimental import pallas as pl
from jax.experimental.pallas import tpu as pltpu


def frozen_bn_kernel(x_ref, scale_ref, shift_ref, o_ref):
    # x_ref: (1, TC, THW); scale/shift: (1, TC, 1) f32, broadcast along lanes.
    x = x_ref[...].astype(jnp.float32)
    o_ref[...] = (x * scale_ref[...] + shift_ref[...]).astype(o_ref.dtype)


def _cdiv(a, b):
    return -(-a // b)


def _choose_tiles(N, C, HW):
    """Fixed lane-aligned tiles; the grid uses cdiv so tails are masked.

    TC: full C when C <= 128 (full-extent block is always legal), else 128
        (a multiple of the packed sublane quantum for f32/bf16/int8).
    THW: full HW when HW <= 4096 (full-extent block is legal even when HW is
        not a multiple of 128), else 4096 (multiple of 128, ~2 MiB f32 tile).
    """
    TC = C if C <= 128 else 128

    THW_CAP = 4096
    THW = HW if HW <= THW_CAP else THW_CAP

    # Keep the grid deep enough (>= 8 blocks) so both v7x TensorCores issue
    # DMAs and the software pipeline stays full on small activations.
    def nblocks(thw):
        return N * _cdiv(C, TC) * _cdiv(HW, thw)

    while nblocks(THW) < 8 and THW >= 256:
        new_thw = max(128, ((THW // 2) // 128) * 128)  # stay a multiple of 128
        if new_thw >= THW:
            break
        THW = new_thw

    return TC, THW


def frozen_batch_norm_2d(x, weight, bias, running_mean, running_var, eps=1e-5):
    N, C, H, W = x.shape
    HW = H * W
    xf = x.reshape(N, C, HW)

    # Fold params into scale/shift once, in f32 (matches PyTorch, where the
    # frozen buffers stay f32 regardless of activation dtype).
    w = weight.astype(jnp.float32)
    b = bias.astype(jnp.float32)
    rm = running_mean.astype(jnp.float32)
    rv = running_var.astype(jnp.float32)
    scale = w * lax.rsqrt(rv + eps)
    shift = b - rm * scale
    scale = scale.reshape(1, C, 1)
    shift = shift.reshape(1, C, 1)

    TC, THW = _choose_tiles(N, C, HW)
    grid = (N, _cdiv(C, TC), _cdiv(HW, THW))

    x_spec = pl.BlockSpec((1, TC, THW), lambda n, ci, si: (n, ci, si))
    # Params are tiny (C * 4 bytes); blocked over C with a constant block
    # index along n/si, so Pallas only re-fetches them when ci changes.
    param_spec = pl.BlockSpec((1, TC, 1), lambda n, ci, si: (0, ci, 0))

    out = pl.pallas_call(
        frozen_bn_kernel,
        out_shape=jax.ShapeDtypeStruct((N, C, HW), x.dtype),
        grid=grid,
        in_specs=[x_spec, param_spec, param_spec],
        out_specs=x_spec,
        compiler_params=pltpu.CompilerParams(
            dimension_semantics=("parallel", "parallel", "parallel"),
            vmem_limit_bytes=32 * 1024 * 1024,
        ),
    )(xf, scale, shift)
    return out.reshape(N, C, H, W)


def frozen_batch_norm_2d_ref(x, weight, bias, running_mean, running_var):
    eps = 1e-5
    w = weight.reshape(1, -1, 1, 1)
    b = bias.reshape(1, -1, 1, 1)
    rv = running_var.reshape(1, -1, 1, 1)
    rm = running_mean.reshape(1, -1, 1, 1)
    scale = w * lax.rsqrt(rv + eps)
    shift = b - rm * scale
    return x * scale + shift


if __name__ == "__main__":
    N, C, H, W = 2, 4, 16, 16
    key = jax.random.PRNGKey(0)
    kx, kw, kb, km, kv = jax.random.split(key, 5)

    x = jax.random.normal(kx, (N, C, H, W), dtype=jnp.float32)

    # Module __init__ gives weight=1, bias=0, running_mean=0, running_var=1.
    # Perturb deterministically so the kernel is exercised non-trivially.
    weight = jnp.ones((C,), jnp.float32) + 0.1 * jax.random.normal(kw, (C,))
    bias = jnp.zeros((C,), jnp.float32) + 0.1 * jax.random.normal(kb, (C,))
    running_mean = jnp.zeros((C,), jnp.float32) + 0.1 * jax.random.normal(km, (C,))
    running_var = jnp.ones((C,), jnp.float32) + 0.1 * jnp.abs(
        jax.random.normal(kv, (C,)))

    out = frozen_batch_norm_2d(x, weight, bias, running_mean, running_var)
    out = jax.block_until_ready(out)

    ref = frozen_batch_norm_2d_ref(x, weight, bias, running_mean, running_var)
    assert out.shape == (N, C, H, W)
    assert jnp.allclose(out, ref, atol=1e-5, rtol=1e-5), "mismatch vs reference"

    print("KERNEL_OK")
</pallas_src>

<mosaic_0001>
module attributes {stable_mosaic.version = 11 : i64} {
  func.func @frozen_bn_kernel(%arg0: i32, %arg1: i32, %arg2: i32, %arg3: memref<1x4x128xf32, #tpu.memory_space<vmem>>, %arg4: memref<1x4x1xf32, #tpu.memory_space<vmem>>, %arg5: memref<1x4x1xf32, #tpu.memory_space<vmem>>, %arg6: memref<1x4x128xf32, #tpu.memory_space<vmem>>) attributes {dimension_semantics = [#tpu.dimension_semantics<parallel>, #tpu.dimension_semantics<parallel>, #tpu.dimension_semantics<parallel>], iteration_bounds = array<i64: 2, 1, 2>, scalar_prefetch = 0 : i64, scratch_operands = 0 : i64, tpu.core_type = #tpu.core_type<tc>, window_params = [{transform_indices = @transform_0, window_bounds = array<i64: 1, 4, 128>}, {transform_indices = @transform_1, window_bounds = array<i64: 1, 4, 1>}, {transform_indices = @transform_2, window_bounds = array<i64: 1, 4, 1>}, {transform_indices = @transform_3, window_bounds = array<i64: 1, 4, 128>}]} {
    %c0 = arith.constant 0 : index
    %c0_0 = arith.constant 0 : index
    %c0_1 = arith.constant 0 : index
    %0 = vector.load %arg3[%c0, %c0_0, %c0_1] : memref<1x4x128xf32, #tpu.memory_space<vmem>>, vector<1x4x128xf32>
    %c0_2 = arith.constant 0 : index
    %c0_3 = arith.constant 0 : index
    %c0_4 = arith.constant 0 : index
    %1 = vector.load %arg4[%c0_2, %c0_3, %c0_4] : memref<1x4x1xf32, #tpu.memory_space<vmem>>, vector<1x4x1xf32>
    %2 = vector.broadcast %1 : vector<1x4x1xf32> to vector<1x4x128xf32>
    %3 = arith.mulf %0, %2 : vector<1x4x128xf32>
    %c0_5 = arith.constant 0 : index
    %c0_6 = arith.constant 0 : index
    %c0_7 = arith.constant 0 : index
    %4 = vector.load %arg5[%c0_5, %c0_6, %c0_7] : memref<1x4x1xf32, #tpu.memory_space<vmem>>, vector<1x4x1xf32>
    %5 = vector.broadcast %4 : vector<1x4x1xf32> to vector<1x4x128xf32>
    %6 = arith.addf %3, %5 : vector<1x4x128xf32>
    %c0_8 = arith.constant 0 : index
    %c0_9 = arith.constant 0 : index
    %c0_10 = arith.constant 0 : index
    %7 = vector.load %arg6[%c0_8, %c0_9, %c0_10] : memref<1x4x128xf32, #tpu.memory_space<vmem>>, vector<1x4x128xf32>
    tpu.vector_store %arg6[%c0_8, %c0_9, %c0_10], %6 {strides = array<i32>} : memref<1x4x128xf32, #tpu.memory_space<vmem>>, vector<1x4x128xf32>,
    return
  }
  func.func @transform_0(%arg0: i32, %arg1: i32, %arg2: i32) -> (i32, i32, i32) {
    %c0_i32 = arith.constant 0 : i32
    return %arg0, %arg1, %arg2 : i32, i32, i32
  }
  func.func @transform_1(%arg0: i32, %arg1: i32, %arg2: i32) -> (i32, i32, i32) {
    %c0_i32 = arith.constant 0 : i32
    %c0_i32_0 = arith.constant 0 : i32
    %c0_i32_1 = arith.constant 0 : i32
    return %c0_i32, %arg1, %c0_i32_0 : i32, i32, i32
  }
  func.func @transform_2(%arg0: i32, %arg1: i32, %arg2: i32) -> (i32, i32, i32) {
    %c0_i32 = arith.constant 0 : i32
    %c0_i32_0 = arith.constant 0 : i32
    %c0_i32_1 = arith.constant 0 : i32
    return %c0_i32, %arg1, %c0_i32_0 : i32, i32, i32
  }
  func.func @transform_3(%arg0: i32, %arg1: i32, %arg2: i32) -> (i32, i32, i32) {
    %c0_i32 = arith.constant 0 : i32
    return %arg0, %arg1, %arg2 : i32, i32, i32
  }
}

</mosaic_0001>

<bundles_post_ra>
// kernel: tpu_custom_call.1
= control target key start
LH: loop header
LB: loop body
LE: loop exit
PB: predicated region body
PF: predicated region fallthrough
CT: control target
= control target key end

     0   :  { %8 = vsyncpa [#allocation3], 0  ;;  %s857_s0 = inlined_call_operand.hbm [shape: f32[2,4,256], index: 0, kind: input, shape index: {}]   ;;  %s858_s1 = inlined_call_operand.vmem [shape: f32[1,4,1], index: 1, kind: input, shape index: {}]   ;;  %s859_s2 = inlined_call_operand.vmem [shape: f32[1,4,1], index: 2, kind: input, shape index: {}]   ;;  %s860_s3 = inlined_call_operand.hbm [shape: f32[2,4,256], index: 3, kind: output, shape index: {}]  }
   0x1   :  { %10 = vsyncpa [#allocation3 + $0x1], 0 }
   0x2   :  { %11 = vsyncpa [#allocation4], 0 }
   0x3   :  { %13 = vsyncpa [#allocation4 + $0x1], 0  ;;  %s657_s12 = smov 0   ;;  %s659_s13 = smov 0  }
   0x4   :  { %s661_s14 = smov 0   ;;  %s663_s15 = smov 0  }
   0x5   :  { %s665_s16 = smov 0   ;;  %s667_s17 = smov 0  }
   0x6   :  { %s669_s18 = smov 0   ;;  %s671_s19 = smov 0  }
   0x7 LB: > { %s407_s20 = sadd.s32 4294967295, %s632_s19   ;;  %s408_s21 = sadd.s32 4294967294, %s632_s19   ;;  %s632_s19 = sphi %s671_s19, %s19_s19   ;;  %s628_s18 = sphi %s669_s18, %s877_s18   ;;  %s624_s17 = sphi %s667_s17, %s876_s17   ;;  %s620_s16 = sphi %s665_s16, %s875_s16   ;;  %s616_s15 = sphi %s663_s15, %s874_s15   ;;  %s612_s14 = sphi %s661_s14, %s873_s14   ;;  %s608_s13 = sphi %s659_s13, %s872_s13   ;;  %s604_s12 = sphi %s657_s12, %s871_s12  }
   0x8   : > { %s31_s22 = sadd.s32 1, %s624_s17  ;;  %s38_s23 = sadd.s32 1, %s628_s18 }
   0x9   : > { %p32_p0 = scmp.ge.s32.totalorder %s31_s22, 2  ;;  %s49_s24 = sadd.s32 1, %s612_s14 }
   0xa   : > { %p56_p1 = scmp.ne.s32.totalorder %s612_s14, %s608_s13  ;;  %p57_p2 = scmp.eq.s32.totalorder %s632_s19, 0 }
   0xb   : > { %s879_s22 = smov (%p32_p0, %s31_s22), 0  ;;  %s881_s23 = smov (!%p32_p0, %s38_s23), %s628_s18 }
   0xc   : > { %s45_s25 = ssub.s32 %s624_s17, %s879_s22  ;;  %p710_p3 = por %p57_p2, %p56_p1 }
   0xd   : > { %p40_p4 = scmp.ge.s32.totalorder %s881_s23, 2  ;;  %p62_p5 = scmp.ne.s32.totalorder %s608_s13, %s604_s12 }
   0xe   : > { %p63_p6 = scmp.eq.s32.totalorder %s407_s20, 0  ;;  %p142_p7 = scmp.eq.s32.totalorder %s407_s20, 3 }
   0xf   : > { %s883_s23 = smov (%p40_p4, %s881_s23), 0  ;;  %p148_p10 = scmp.eq.s32.totalorder %s408_s21, 3 }
  0x10   : > { %p718_p8 = por %p63_p6, %p62_p5  ;;  %p722_p9 = por %p142_p7, %p56_p1 }
  0x11   : > { %s42_s29 = ssub.s32 %s628_s18, %s883_s23  ;;  %p728_p12 = por %p148_p10, %p62_p5 }
  0x12   : > { %s864_s28 = scalar_select %p722_p9, 1, 0 }
  0x13   : > { %s46_s30 = sor.u32 %s45_s25, %s42_s29  ;;  %p436_p13 = scmp.lt.s32.totalorder %s632_s19, 4 }
  0x14   : > { %p47_p11 = scmp.eq.s32.totalorder %s46_s30, 0  ;;  %s182_s5 = sand.u32 1, %s612_s14  }
  0x15   : > { %s865_s4 = scalar_select %p728_p12, 1, 0 }
  0x16   : > { %s735_s6 = scalar_select %p47_p11, %s612_s14, %s49_s24  }
  0x17   : > { %s413_s7 = sshll.u32 %s182_s5, 2  ;;  %s414_s8 = sshll.u32 %s628_s18, 1 }
  0x18   : > { %s193_s9 = sadd.s32 %s624_s17, %s414_s8  ;;  %s186_s10 = scalar_lea.vmem [#allocation2], %s413_s7 }
  0x19   : > { %s197_s11 = sshll.u32 %s186_s10, 4  ;;  %s415_s20 = sshll.u32 %s193_s9, 6  ;;  %s739_s11 = int_to_ptr.vmem [resolvable:$true] %s197_s11 }
  0x1a   : > { %s744_s29 = scalar_lea.hbm %s857_s0, %s415_s20  ;;  %p748_p0 = pnand %p436_p13, %p710_p3 }
  0x1b   : > { %s183_s30 = scalar_lea.sflag [#allocation3], %s182_s5  ;;  %s504_s7 = scalar_lea.hbm %s744_s29, 64 }
  0x1c   : > { %p505_p4 = scmp.ne.s32.totalorder %s744_s29, %s504_s7  ;;  %p506_p5 = pneg %p748_p0 }
  0x1d   : > { %s509_s9 = scalar_lea.hbm %s857_s0, 256  ;;  %p510_p3 = scmp.lt.u32.totalorder %s744_s29, %s857_s0 }
  0x1e   : > { %p507_p6 = pnand %p506_p5, %p505_p4  ;;  %p511_p10 = scmp.lt.u32.totalorder %s509_s9, %s504_s7 }
  0x1f   : > { %p513_p13 = scmp.lt.u32.totalorder %s504_s7, %s744_s29 }
  0x20   : > { %p508_p7 = pneg %p507_p6  ;;  %p512_p11 = por %p511_p10, %p510_p3 }
  0x22   : > { %p514_p1 = por %p513_p13, %p512_p11 }
  0x24   : > { %p515_p2 = pnand %p514_p1, %p508_p7 }
  0x26   : > { %518 = shalt.err (!%p515_p2)
}
  0x27   : > { %s519_s5 = scalar_lea.vmem %s739_s11, 64  ;;  %s634_s21 = smov [#allocation2]  }
  0x28   : > { %p520_p4 = scmp.ne.s32.totalorder %s739_s11, %s519_s5  ;;  %s524_s25 = sshll.u32 %s634_s21, 4  ;;  %s525_s25 = int_to_ptr.vmem [resolvable:$false] %s524_s25 }
  0x29   : > { %s526_s26 = scalar_lea.vmem %s525_s25, 128  ;;  %p527_p9 = scmp.lt.s32.totalorder %s739_s11, %s525_s25 }
  0x2a   : > { %p522_p6 = pnand %p520_p4, %p506_p5  ;;  %p528_p3 = scmp.lt.s32.totalorder %s526_s26, %s519_s5 }
  0x2c   : > { %p523_p12 = pneg %p522_p6  ;;  %p529_p10 = por %p528_p3, %p527_p9 }
  0x2e   : > { %p530_p11 = pnand %p529_p10, %p523_p12 }
  0x30   : > { %533 = shalt.err (!%p530_p11)
}
  0x31   : > { %431 = dma.hbm_to_vmem [thread:$0]  (!%p748_p0), %s744_s29, 64, %s739_s11, %s183_s30  }
  0x32   : > { %p867_p1 = scmp.lt.s32.totalorder %s632_s19, 5  ;;  %p868_p2 = scmp.ge.s32.totalorder %s632_s19, 1 }
  0x34   : > { %p203_p5 = pnand %p868_p2, %p867_p1 }
  0x35   : > { %s784_s7 = sand.u32 (!%p203_p5), 1, %s608_s13  }
  0x36   : > { %206 = sbr.rel (%p203_p5) target bundleno = 212 (0xd4), region = 32  ;;  %s417_s8 = sshll.u32 (!%p203_p5), %s784_s7, 2 }
  0x37   : > { %s209_s9 = scalar_lea.sflag (!%p203_p5), [#allocation3], %s784_s7  ;;  %s212_s10 = scalar_lea.vmem (!%p203_p5), [#allocation2], %s417_s8 }
  0x3d   : > { %595 = dma.done.wait (%p718_p8), %s209_s9, 64  }
  0x3e   : > { %597 = vsyncadd (%p718_p8), %s209_s9, 4294967232  ;;  %v635_v0 = vmov 0   ;;  %v252_v1 = vld [vmem:[%s858_s1] sm:$0xf]  ;;  %s420_s20 = sshll.u32 %s620_s16, 1  ;;  %s242_s21 = scalar_lea.vmem [#allocation5], %s417_s8 }
  0x3f   : > { %503 = vset.pattern.permute.xlu0 %v635_v0  ;;  %v259_v2 = vld [vmem:[%s859_s2] sm:$0xf]  ;;  %s281_s5 = sadd.s32 %s616_s15, %s420_s20  ;;  %s285_s25 = sshll.u32 %s242_s21, 4  ;;  %s805_s25 = int_to_ptr.vmem [resolvable:$true] %s285_s25 }
  0x40   : > { %255 = vperm.xlu0 %503, %v252_v1   ;;  %v251_v4 = vld [vmem:[%s212_s10] sm:$0xf]  ;;  %s421_s27 = sshll.u32 %s281_s5, 6  ;;  %s268_s15 = scalar_lea.sflag [#allocation4], %s784_s7 }
  0x41   : > { %s803_s11 = scalar_lea.hbm %s860_s3, %s421_s27  ;;  %s534_s16 = scalar_lea.vmem %s805_s25, 64 }
  0x42   : > { %p535_p8 = scmp.ne.s32.totalorder %s805_s25, %s534_s16  ;;  %p869_p9 = scmp.ne.s32.totalorder %s864_s28, 0 }
  0x43   : > { %s636_s8 = smov [#allocation5]  }
  0x44   : > { %262 = vperm.xlu0 %503, %v259_v2   ;;  %p536_p12 = pnand %p535_p8, %p869_p9  ;;  %s538_s10 = sshll.u32 %s636_s8, 4  ;;  %s539_s10 = int_to_ptr.vmem [resolvable:$false] %s538_s10 }
  0x45   : > { %s540_s29 = scalar_lea.vmem %s539_s10, 128  ;;  %p541_p7 = scmp.lt.s32.totalorder %s805_s25, %s539_s10 }
  0x46   : > { %p537_p0 = pneg %p536_p12  ;;  %p542_p13 = scmp.lt.s32.totalorder %s540_s29, %s534_s16 }
  0x48   : > { %p543_p4 = por %p542_p13, %p541_p7 }
  0x4a   : > { %p544_p6 = pnand %p543_p4, %p537_p0 }
  0xbf   : > { %v256_v3 = vpop.permute.xlu0 %255 }
  0xc0   : > { %v258_v5 = vmul.f32 %v256_v3, %v251_v4 }
  0xc3   : > { %v263_v6 = vpop.permute.xlu0 %262 }
  0xc4   : > { %v265_v7 = vadd.f32 %v263_v6, %v258_v5 }
  0xc6   : > { %266 = vst [vmem:[%s242_s21] sm:$0xf] %v265_v7 }
  0xc7   : > { %547 = shalt.err (!%p544_p6)
}
  0xc8   : > { %s548_s7 = scalar_lea.hbm %s803_s11, 64  ;;  %s552_s20 = scalar_lea.hbm %s860_s3, 256 }
  0xc9   : > { %p549_p3 = scmp.ne.s32.totalorder %s803_s11, %s548_s7  ;;  %p553_p1 = scmp.lt.u32.totalorder %s803_s11, %s860_s3 }
  0xca   : > { %p554_p2 = scmp.lt.u32.totalorder %s552_s20, %s548_s7  ;;  %p556_p8 = scmp.lt.u32.totalorder %s548_s7, %s803_s11 }
  0xcb   : > { %p550_p10 = pnand %p549_p3, %p869_p9 }
  0xcc   : > { %p555_p5 = por %p554_p2, %p553_p1 }
  0xcd   : > { %p551_p11 = pneg %p550_p10 }
  0xce   : > { %p557_p12 = por %p556_p8, %p555_p5 }
  0xd0   : > { %p558_p0 = pnand %p557_p12, %p551_p11 }
  0xd2   : > { %561 = shalt.err (!%p558_p0)
}
  0xd3   : > { %426 = dma.vmem_to_hbm [thread:$0]  (%p869_p9), %s805_s25, 64, %s803_s11, %s268_s15  }
  0xd4 PF: > { %p437_p7 = scmp.ge.s32.totalorder %s632_s19, 2  ;;  %s297_s21 = sand.u32 1, %s604_s12  }
  0xd5   : > { %p870_p13 = scmp.ne.s32.totalorder %s865_s4, 0  ;;  %s298_s26 = scalar_lea.sflag [#allocation4], %s297_s21 }
  0xd7   : > { %p433_p4 = pnand %p437_p7, %p870_p13 }
  0xd9   : > { %599 = dma.done.wait (!%p433_p4), %s298_s26, 64  }
  0xda   : > { %601 = vsyncadd (!%p433_p4), %s298_s26, 4294967232  ;;  %s19_s19 = sadd.s32 1, %s632_s19   ;;  %s871_s12 = smov %s608_s13 }
  0xdb   : > { %p16_p6 = scmp.ge.s32.totalorder %s19_s19, 6   ;;  %s872_s13 = smov %s612_s14 }
  0xdc   : > { %s873_s14 = smov %s735_s6  ;;  %s874_s15 = smov %s624_s17 }
  0xdd   : > { %s875_s16 = smov %s628_s18  ;;  %s876_s17 = smov %s879_s22 }
  0xde   : > { %s877_s18 = smov %s883_s23  ;;  %18 = sbr.rel (!%p16_p6) target bundleno = 7 (0x7), region = 83 }
  0xe5   :  { %303 = vsyncpa [#allocation3], 1 }
  0xe6   :  { %305 = vsyncpa [#allocation3 + $0x1], 1 }
  0xe7   :  { %306 = vsyncpa [#allocation4], 1 }
  0xe8   :  { %308 = vsyncpa [#allocation4 + $0x1], 1 }

</bundles_post_ra>
